<compile_context>
chip_gen: v5e
topology: v5e:2x2
jax: 0.10.0
libtpu: 0.0.40
codegen_flags: <defaults>
</compile_context>

<pallas_src>
import functools
import math

import jax
import jax.numpy as jnp
from jax.experimental import pallas as pl
from jax.experimental.pallas import tpu as pltpu


def _round_up(v, m):
    return ((v + m - 1) // m) * m


def _slot_width(attention_dim):
    # Pack [Wq|Wk|Wv] tightly when all three fit in one 128-lane tile;
    # otherwise give each projection its own 128-aligned lane slot.
    return attention_dim if 3 * attention_dim <= 128 else _round_up(attention_dim, 128)


def fuse_qkv_weights(wq, wk, wv, model_dim, compute_dtype=jnp.bfloat16):
    """Build the fused [Wq*scale | Wk | Wv] matrix ONCE (hoisted out of the
    forward path).  wq/wk/wv are (model_dim, attention_dim), i.e. the
    nn.Linear weights pre-transposed so q = x @ Wq (bias=False, as in the module)."""
    D, A = wq.shape
    assert wk.shape == (D, A) and wv.shape == (D, A)
    scale = 1.0 / math.sqrt(model_dim)
    a_slot = _slot_width(A)
    if a_slot == A:
        w = jnp.concatenate([wq * scale, wk, wv], axis=1)           # (D, 3*A)
    else:
        w = jnp.zeros((D, 3 * a_slot), dtype=jnp.float32)
        w = w.at[:, 0:A].set(wq * scale)
        w = w.at[:, a_slot:a_slot + A].set(wk)
        w = w.at[:, 2 * a_slot:2 * a_slot + A].set(wv)
    return w.astype(compute_dtype)


def _attention_head_kernel(x_ref, w_ref, o_ref, *, bt, seq, a_slot, attn_dim):
    # x_ref: (bt*seq, D)        batch-tile of activations (caller dtype)
    # w_ref: (D, 3*a_slot)      fused [Wq*scale | Wk | Wv] in the compute dtype
    # o_ref: (bt*seq, attn_dim) exact-width output (no padding, no post-slice)
    compute_dtype = w_ref.dtype
    x = x_ref[...].astype(compute_dtype)
    w = w_ref[...]

    # Single fused projection matmul on the MXU, f32 accumulation.
    qkv = jnp.dot(x, w, preferred_element_type=jnp.float32)          # (bt*seq, 3*a_slot)

    # Static lane-offset slices (packed case) / lane-tile-aligned (padded case).
    q = qkv[:, 0:attn_dim].reshape(bt, seq, attn_dim).astype(compute_dtype)
    k = qkv[:, a_slot:a_slot + attn_dim].reshape(bt, seq, attn_dim).astype(compute_dtype)
    v = qkv[:, 2 * a_slot:2 * a_slot + attn_dim].reshape(bt, seq, attn_dim).astype(compute_dtype)

    # scores = (x Wq / sqrt(model_dim)) @ (x Wk)^T  — scale already folded into Wq.
    # Contract last axes directly (no explicit transpose / XLU vxpose).
    s = jnp.einsum("bqd,bkd->bqk", q, k, preferred_element_type=jnp.float32)

    # Numerically-stable softmax over keys, kept in f32.
    s = s - jnp.max(s, axis=-1, keepdims=True)
    p = jnp.exp(s)
    p = p * pl.reciprocal(jnp.sum(p, axis=-1, keepdims=True), approx=True)

    out = jnp.einsum("bqk,bkd->bqd", p.astype(compute_dtype), v,
                     preferred_element_type=jnp.float32)             # (bt, seq, attn_dim)
    o_ref[...] = out.reshape(bt * seq, attn_dim).astype(o_ref.dtype)


def attention_head(x, w_fused, attention_dim, *, batch_tile=None):
    """x: (B, S, model_dim); w_fused from fuse_qkv_weights. Returns (B, S, A)."""
    B, S, D = x.shape
    A = attention_dim
    a_slot = _slot_width(A)
    assert w_fused.shape == (D, 3 * a_slot), (w_fused.shape, (D, 3 * a_slot))

    # --- tile selection: grid >= 2 (v7x megacore / pipelining) and ~<=512 rows/step.
    if batch_tile is None:
        bt = max(1, min(B // 2 if B >= 2 else 1, max(1, 512 // S)))
        while B % bt != 0:
            bt -= 1
    else:
        bt = batch_tile
    assert B % bt == 0, "batch_tile must divide batch"
    rows = bt * S

    # Row tiles must be sublane-tile aligned for the caller dtype (8 for 4-byte,
    # 16 for 2-byte) unless the block covers the whole array.
    sublane = {4: 8, 2: 16, 1: 32}[jnp.dtype(x.dtype).itemsize]
    assert rows == B * S or rows % sublane == 0, (
        f"bt*S={rows} must be a multiple of {sublane} for dtype {x.dtype}")

    # O(S^2) f32 score + prob tiles live in VMEM; keep well under the v7x 64 MiB
    # budget.  For longer sequences, block the KV axis with an online (flash-style)
    # softmax instead of growing this tile.
    score_bytes = 2 * bt * S * S * 4
    assert score_bytes <= 24 * 1024 * 1024, (
        "S^2 score tile too large for unblocked softmax; reduce batch_tile or "
        "use a KV-blocked (flash-style) kernel")

    kernel = functools.partial(_attention_head_kernel,
                               bt=bt, seq=S, a_slot=a_slot, attn_dim=A)

    x2 = x.reshape(B * S, D)   # fold batch into the matmul M dimension (free under jit)

    out = pl.pallas_call(
        kernel,
        out_shape=jax.ShapeDtypeStruct((B * S, A), x.dtype),
        grid=(B // bt,),
        in_specs=[
            # If profiling shows the x-tile DMA exposed, add
            # pipeline_mode=pl.Buffered(3) here.
            pl.BlockSpec((rows, D), lambda i: (i, 0)),            # batch tile of x
            pl.BlockSpec((D, 3 * a_slot), lambda i: (0, 0)),      # fused weights (resident)
        ],
        out_specs=pl.BlockSpec((rows, A), lambda i: (i, 0)),       # exact-width output
        compiler_params=pltpu.CompilerParams(
            dimension_semantics=("parallel",),
            vmem_limit_bytes=48 * 1024 * 1024,
        ),
    )(x2, w_fused)

    return out.reshape(B, S, A)


def attention_head_reference(x, wq, wk, wv, model_dim):
    q = x @ wq
    k = x @ wk
    v = x @ wv
    z = jnp.einsum("bsa,bta->bst", q, k) / math.sqrt(model_dim)
    z = jax.nn.softmax(z, axis=2)
    return jnp.einsum("bst,bta->bsa", z, v)


if __name__ == "__main__":
    # Small shapes consistent with the module's forward: x is (B, S, model_dim).
    batch, seq, model_dim, attention_dim = 2, 8, 32, 16

    key = jax.random.PRNGKey(0)
    kx, kq, kk, kv = jax.random.split(key, 4)

    x = jax.random.normal(kx, (batch, seq, model_dim), dtype=jnp.float32)

    # Deterministic weight init (mimics nn.Linear's uniform(-1/sqrt(fan_in), +)),
    # stored pre-transposed as (model_dim, attention_dim) so q = x @ Wq.
    bound = 1.0 / math.sqrt(model_dim)
    wq = jax.random.uniform(kq, (model_dim, attention_dim), jnp.float32, -bound, bound)
    wk = jax.random.uniform(kk, (model_dim, attention_dim), jnp.float32, -bound, bound)
    wv = jax.random.uniform(kv, (model_dim, attention_dim), jnp.float32, -bound, bound)

    ref = attention_head_reference(x, wq, wk, wv, model_dim)

    fwd = jax.jit(functools.partial(attention_head, attention_dim=attention_dim))

    # Default path: bf16 MXU operands, f32 accumulation (~2x matmul rate on all gens).
    w_bf16 = fuse_qkv_weights(wq, wk, wv, model_dim, compute_dtype=jnp.bfloat16)
    out_bf16 = jax.block_until_ready(fwd(x, w_bf16))
    assert out_bf16.shape == (batch, seq, attention_dim)
    assert jnp.allclose(out_bf16, ref, atol=3e-2, rtol=3e-2), "bf16 path mismatch"

    # f32-operand path for tight parity with the PyTorch module (approx-reciprocal
    # softmax introduces ~1e-4-level relative error, hence 2e-3 tolerance).
    w_f32 = fuse_qkv_weights(wq, wk, wv, model_dim, compute_dtype=jnp.float32)
    out_f32 = jax.block_until_ready(fwd(x, w_f32))
    assert out_f32.shape == (batch, seq, attention_dim)
    assert jnp.allclose(out_f32, ref, atol=2e-3, rtol=2e-3), "f32 path mismatch"

    print("KERNEL_OK")
</pallas_src>

<mosaic_0001>
module attributes {stable_mosaic.version = 11 : i64} {
  func.func @_attention_head_kernel(%arg0: i32, %arg1: memref<8x32xf32, #tpu.memory_space<vmem>>, %arg2: memref<32x48xbf16, #tpu.memory_space<vmem>>, %arg3: memref<8x16xf32, #tpu.memory_space<vmem>>) attributes {dimension_semantics = [#tpu.dimension_semantics<parallel>], iteration_bounds = array<i64: 2>, scalar_prefetch = 0 : i64, scratch_operands = 0 : i64, tpu.core_type = #tpu.core_type<tc>, window_params = [{transform_indices = @transform_0, window_bounds = array<i64: 8, 32>}, {pipeline_mode = #tpu.pipeline_mode<synchronous>, transform_indices = @transform_1, window_bounds = array<i64: 32, 48>}, {transform_indices = @transform_2, window_bounds = array<i64: 8, 16>}]} {
    %c0 = arith.constant 0 : index
    %c0_0 = arith.constant 0 : index
    %0 = vector.load %arg1[%c0, %c0_0] : memref<8x32xf32, #tpu.memory_space<vmem>>, vector<8x32xf32>
    %1 = arith.truncf %0 : vector<8x32xf32> to vector<8x32xbf16>
    %c0_1 = arith.constant 0 : index
    %c0_2 = arith.constant 0 : index
    %2 = vector.load %arg2[%c0_1, %c0_2] : memref<32x48xbf16, #tpu.memory_space<vmem>>, vector<32x48xbf16>
    %cst = arith.constant dense<0.000000e+00> : vector<8x48xf32>
    %3 = tpu.matmul %1, %2, %cst {dimension_numbers = #tpu.dot_dimension_numbers<[1], [0], [0], [1], [0, 0, 1, 1], [], []>} : vector<8x32xbf16>, vector<32x48xbf16>, vector<8x48xf32> -> vector<8x48xf32>
    %4 = vector.extract_strided_slice %3 {offsets = [0, 0], sizes = [8, 16], strides = [1, 1]} : vector<8x48xf32> to vector<8x16xf32>
    %5 = vector.shape_cast %4 : vector<8x16xf32> to vector<1x8x16xf32>
    %6 = arith.truncf %5 : vector<1x8x16xf32> to vector<1x8x16xbf16>
    %7 = vector.extract_strided_slice %3 {offsets = [0, 16], sizes = [8, 16], strides = [1, 1]} : vector<8x48xf32> to vector<8x16xf32>
    %8 = vector.shape_cast %7 : vector<8x16xf32> to vector<1x8x16xf32>
    %9 = arith.truncf %8 : vector<1x8x16xf32> to vector<1x8x16xbf16>
    %10 = vector.extract_strided_slice %3 {offsets = [0, 32], sizes = [8, 16], strides = [1, 1]} : vector<8x48xf32> to vector<8x16xf32>
    %11 = vector.shape_cast %10 : vector<8x16xf32> to vector<1x8x16xf32>
    %12 = arith.truncf %11 : vector<1x8x16xf32> to vector<1x8x16xbf16>
    "tpu.trace_start"() <{level = 10 : i32, message = "bqd,bkd->bqk"}> : () -> ()
    %cst_3 = arith.constant dense<0.000000e+00> : vector<1x8x8xf32>
    %13 = tpu.matmul %6, %9, %cst_3 {dimension_numbers = #tpu.dot_dimension_numbers<[2], [2], [1], [1], [0, 0, 0, 1, 1, 1], [0], [0]>} : vector<1x8x16xbf16>, vector<1x8x16xbf16>, vector<1x8x8xf32> -> vector<1x8x8xf32>
    "tpu.trace_stop"() : () -> ()
    %cst_4 = arith.constant dense<0xFF800000> : vector<1x8xf32>
    %14 = vector.multi_reduction <maximumf>, %13, %cst_4 [2] : vector<1x8x8xf32> to vector<1x8xf32>
    %15 = vector.shape_cast %14 : vector<1x8xf32> to vector<1x8x1xf32>
    %16 = vector.broadcast %15 : vector<1x8x1xf32> to vector<1x8x8xf32>
    %17 = arith.subf %13, %16 : vector<1x8x8xf32>
    %18 = math.exp %17 : vector<1x8x8xf32>
    %cst_5 = arith.constant dense<0.000000e+00> : vector<1x8xf32>
    %19 = vector.multi_reduction <add>, %18, %cst_5 [2] : vector<1x8x8xf32> to vector<1x8xf32>
    %20 = vector.shape_cast %19 : vector<1x8xf32> to vector<1x8x1xf32>
    %21 = tpu.reciprocal %20 {approx = true} : vector<1x8x1xf32> -> vector<1x8x1xf32>
    %22 = vector.broadcast %21 : vector<1x8x1xf32> to vector<1x8x8xf32>
    %23 = arith.mulf %18, %22 : vector<1x8x8xf32>
    %24 = arith.truncf %23 : vector<1x8x8xf32> to vector<1x8x8xbf16>
    "tpu.trace_start"() <{level = 10 : i32, message = "bqk,bkd->bqd"}> : () -> ()
    %cst_6 = arith.constant dense<0.000000e+00> : vector<1x8x16xf32>
    %25 = tpu.matmul %24, %12, %cst_6 {dimension_numbers = #tpu.dot_dimension_numbers<[2], [1], [1], [2], [0, 0, 0, 1, 1, 2], [0], [0]>} : vector<1x8x8xbf16>, vector<1x8x16xbf16>, vector<1x8x16xf32> -> vector<1x8x16xf32>
    "tpu.trace_stop"() : () -> ()
    %26 = vector.shape_cast %25 : vector<1x8x16xf32> to vector<8x16xf32>
    %c0_7 = arith.constant 0 : index
    %c0_8 = arith.constant 0 : index
    %27 = vector.load %arg3[%c0_7, %c0_8] : memref<8x16xf32, #tpu.memory_space<vmem>>, vector<8x16xf32>
    tpu.vector_store %arg3[%c0_7, %c0_8], %26 {strides = array<i32>} : memref<8x16xf32, #tpu.memory_space<vmem>>, vector<8x16xf32>,
    return
  }
  func.func @transform_0(%arg0: i32) -> (i32, i32) {
    %c0_i32 = arith.constant 0 : i32
    %c0_i32_0 = arith.constant 0 : i32
    return %arg0, %c0_i32 : i32, i32
  }
  func.func @transform_1(%arg0: i32) -> (i32, i32) {
    %c0_i32 = arith.constant 0 : i32
    %c0_i32_0 = arith.constant 0 : i32
    %c0_i32_1 = arith.constant 0 : i32
    return %c0_i32, %c0_i32_0 : i32, i32
  }
  func.func @transform_2(%arg0: i32) -> (i32, i32) {
    %c0_i32 = arith.constant 0 : i32
    %c0_i32_0 = arith.constant 0 : i32
    return %arg0, %c0_i32 : i32, i32
  }
}

</mosaic_0001>

<bundles_post_ra>
// kernel: attention_head.1
= control target key start
LH: loop header
LB: loop body
LE: loop exit
PB: predicated region body
PF: predicated region fallthrough
CT: control target
= control target key end

     0   :  { %7 = vsyncpa [#allocation3], 0  ;;  %s762_s0 = inlined_call_operand.hbm [shape: f32[16,32], index: 0, kind: input, shape index: {}]   ;;  %s763_s1 = inlined_call_operand.hbm [shape: bf16[32,48], index: 1, kind: input, shape index: {}]   ;;  %s764_s2 = inlined_call_operand.hbm [shape: f32[16,16], index: 2, kind: output, shape index: {}]  }
   0x1   :  { %9 = vsyncpa [#allocation3 + $0x1], 0 }
   0x2   :  { %10 = vsyncpa [#allocation6], 0 }
   0x3   :  { %11 = vsyncpa [#allocation4], 0 }
   0x4   :  { %13 = vsyncpa [#allocation4 + $0x1], 0  ;;  %s616_s9 = smov 0   ;;  %s618_s10 = smov 0  }
   0x5   :  { %s620_s11 = smov 0   ;;  %s622_s12 = smov 0  }
   0x6 LB: > { %s108_s15 = sshll.u32 %s763_s1, 4  ;;  %s640_s16 = sadd.s32 4294967295, %s594_s12   ;;  %s594_s12 = sphi %s622_s12, %s774_s12   ;;  %s590_s11 = sphi %s620_s11, %s773_s11   ;;  %s586_s10 = sphi %s618_s10, %s772_s10   ;;  %s582_s9 = sphi %s616_s9, %s771_s9   ;;  %s109_s15 = int_to_ptr.hbm [resolvable:$true] %s108_s15 }
   0x7   : > { %p373_p0 = scmp.ge.s32.totalorder %s594_s12, 1  ;;  %p40_p1 = scmp.eq.s32.totalorder %s640_s16, 0 }
   0x8   : > { %p97_p2 = scmp.lt.s32.totalorder %s594_s12, 3  ;;  %s596_s18 = smov [#allocation5]  }
   0x9   : > { %s110_s19 = sshll.u32 %s596_s18, 4  ;;  %s597_s20 = smov 64   ;;  %s111_s19 = int_to_ptr.vmem [resolvable:$true] %s110_s19 }
   0xa   : > { %p645_p3 = pnand %p373_p0, %p97_p2  ;;  %s598_s21 = smov 4  }
   0xb   : > { %s372_s22 = sadd.s32 4294967294, %s594_s12   ;;  %s656_s23 = sadd.s32 1, %s594_s12  }
   0xc   : > { %p407_p4 = pneg %p645_p3  ;;  %s26_s24 = sadd.s32 1, %s590_s11 }
   0xd   : > { %s23_s25 = ssub.s32 %s594_s12, %s656_s23  ;;  %p33_p7 = scmp.ne.s32.totalorder %s590_s11, %s586_s10 }
   0xe   : > { %p408_p6 = pnand %p407_p4, %p40_p1  ;;  %p24_p8 = scmp.eq.s32.totalorder %s23_s25, 0 }
   0xf   : > { %p34_p9 = scmp.eq.s32.totalorder %s594_s12, 0  ;;  %p39_p10 = scmp.ne.s32.totalorder %s586_s10, %s582_s9 }
  0x10   : > { %410 = dma.hbm_to_vmem [thread:$0]  (!%p408_p6), %s109_s15, 256, %s111_s19, [#allocation6], %s597_s20, %s597_s20, %s598_s21  }
  0x11   : > { %p84_p11 = scmp.eq.s32.totalorder %s640_s16, 1  ;;  %p672_p12 = por %p40_p1, %p39_p10 }
  0x12   : > { %s668_s26 = scalar_select %p24_p8, %s590_s11, %s26_s24  }
  0x13   : > { %p676_p13 = por %p84_p11, %p33_p7  ;;  %p90_p0 = scmp.eq.s32.totalorder %s372_s22, 1 }
  0x14   : > { %p35_p2 = por %p34_p9, %p33_p7  ;;  %s124_s29 = sand.u32 1, %s590_s11  }
  0x15   : > { %p681_p4 = por %p90_p0, %p39_p10  ;;  %p420_p6 = scmp.lt.s32.totalorder %s594_s12, 2 }
  0x16   : > { %s376_s3 = sshll.u32 %s124_s29, 3  ;;  %s377_s4 = sshll.u32 %s594_s12, 3 }
  0x17   : > { %s132_s7 = scalar_lea.hbm %s762_s0, %s377_s4  ;;  %s128_s13 = scalar_lea.vmem [#allocation2], %s376_s3 }
  0x18   : > { %s134_s8 = sshll.u32 %s132_s7, 4  ;;  %s136_s14 = sshll.u32 %s128_s13, 4  ;;  %s135_s8 = int_to_ptr.hbm [resolvable:$true] %s134_s8  ;;  %s137_s14 = int_to_ptr.vmem [resolvable:$true] %s136_s14 }
  0x19   : > { %p690_p8 = pnand %p420_p6, %p35_p2  ;;  %s125_s18 = scalar_lea.sflag [#allocation3], %s124_s29 }
  0x1a   : > { %s494_s19 = sshra.s32 %s135_s8, 4  ;;  %s501_s24 = scalar_lea.hbm %s762_s0, 16  ;;  %s495_s19 = int_to_ptr.hbm [resolvable:$true] %s494_s19 }
  0x1b   : > { %s496_s20 = scalar_lea.hbm %s495_s19, 8  ;;  %p498_p9 = pneg %p690_p8 }
  0x1c   : > { %p497_p7 = scmp.ne.s32.totalorder %s495_s19, %s496_s20  ;;  %p502_p0 = scmp.lt.s32.totalorder %s495_s19, %s762_s0 }
  0x1d   : > { %p503_p2 = scmp.lt.s32.totalorder %s501_s24, %s496_s20 }
  0x1e   : > { %p499_p10 = pnand %p498_p9, %p497_p7 }
  0x1f   : > { %p504_p6 = por %p503_p2, %p502_p0 }
  0x20   : > { %p500_p11 = pneg %p499_p10 }
  0x22   : > { %p505_p5 = pnand %p504_p6, %p500_p11 }
  0x24   : > { %508 = shalt.err (!%p505_p5)
}
  0x25   : > { %414 = dma.hbm_to_vmem [thread:$0]  (!%p690_p8), %s135_s8, 128, %s137_s14, %s125_s18  }
  0x26   : > { %145 = sbr.rel (%p645_p3) target bundleno = 848 (0x350), region = 28  ;;  %s707_s29 = sand.u32 (!%p645_p3), 1, %s586_s10  }
  0x27   : > { %s379_s4 = sshll.u32 (!%p645_p3), %s707_s29, 3  ;;  %s148_s5 = scalar_lea.sflag (!%p645_p3), [#allocation3], %s707_s29 }
  0x28   : > { %s151_s6 = scalar_lea.vmem (!%p645_p3), [#allocation2], %s379_s4 }
  0x2b   : > { %569 = dma.done.wait (%p672_p12), %s148_s5, 128  }
  0x2c   : > { %571 = vsyncadd (%p672_p12), %s148_s5, 4294967168 }
  0x2d   : > { %573 = dma.done.wait (%p40_p1), [#allocation6], 256  }
  0x2e   : > { %575 = vsyncadd (%p40_p1), [#allocation6], 4294967040  ;;  %v398_v0 = vld [vmem:[#allocation5 + $0x8] sm:$0xff]  ;;  %v397_v1 = vld [vmem:[#allocation5] sm:$0xff]  ;;  %vm197_vm0 = vcmask 261120   ;;  %s599_s17 = smov 112  }
  0x2f   : > { %207 = vmatpush.bf16.msra.mxu0 %v398_v0  ;;  %v179_v2 = vld [vmem:[%s151_s6] sm:$0xff]  ;;  %vm220_vm1 = vcmask 130048   ;;  %vm240_vm2 = vcmask 64512   ;;  %s600_s27 = smov 96   ;;  %vm258_vm3 = vcmask 1043456   ;;  %s394_s7 = sshll.u32 %s640_s16, 3 }
  0x30   : > { %v180_v3 = vpack.c.bf16 %v179_v2, %v179_v2  ;;  %s287_s14 = scalar_lea.hbm %s764_s2, %s394_s7  ;;  %s177_s15 = scalar_lea.vmem [#allocation7], %s379_s4 }
  0x31   : > { %s289_s18 = sshll.u32 %s177_s15, 4  ;;  %s291_s19 = sshll.u32 %s287_s14, 4  ;;  %s290_s18 = int_to_ptr.vmem [resolvable:$true] %s289_s18  ;;  %s292_s19 = int_to_ptr.hbm [resolvable:$true] %s291_s19 }
  0x32   : > { %s277_s20 = scalar_lea.sflag [#allocation4], %s707_s29  ;;  %s538_s21 = sshra.s32 %s292_s19, 4  ;;  %s539_s21 = int_to_ptr.hbm [resolvable:$true] %s538_s21 }
  0x33   : > { %208 = vmatpush.bf16.msra.mxu0 %v397_v1  ;;  %s540_s22 = scalar_lea.hbm %s539_s21, 8  ;;  %s544_s25 = scalar_lea.hbm %s764_s2, 16 }
  0x34   : > { %p541_p1 = scmp.ne.s32.totalorder %s539_s21, %s540_s22  ;;  %p545_p12 = scmp.lt.s32.totalorder %s539_s21, %s764_s2 }
  0x35   : > { %p546_p8 = scmp.lt.s32.totalorder %s544_s25, %s540_s22 }
  0x36   : > { %390 = vmatmul.msk.bf16.vlgmr.msra.gmra.mxu0 %vm197_vm0, %v180_v3  ;;  %p542_p3 = pnand %p541_p1, %p676_p13 }
  0x37   : > { %p547_p7 = por %p546_p8, %p545_p12 }
  0x38   : > { %p543_p5 = pneg %p542_p3 }
  0x3a   : > { %p548_p9 = pnand %p547_p7, %p543_p5 }
  0xb3   : > { %v210_v4 = vpop.f32.mrf.mxu0 }
  0xb4   : > { %v214_v5 = vpack.c.bf16 %v210_v4, %v210_v4 }
  0xb6   : > { %v216_v6 = vunpack.c.l.b16 %v214_v5 }
  0xb8   : > { %v217_v7 = vpack.c.b16 %v216_v6, %v216_v6 }
  0xba   : > { %218 = vrot.lane.b32.xlu0 %v217_v7, %s599_s17 }
  0xbb   : > { %v212_v8 = vpop.f32.mrf.mxu0 }
 0x12c   : > { %v219_v9 = vpop.permute.xlu0 %218 }
 0x12d   : > { %v225_v10 = vsel %vm220_vm1, %v219_v9, 0 }
 0x12e   : > { %234 = vmatpush.bf16.xpose.msra.mxu1 %v225_v10 }
 0x135   : > { %391 = vmatmul.msk.bf16.vlgmr.msra.gmra.mxu1 %vm220_vm1, %v214_v5 }
 0x1b2   : > { %v236_v11 = vpop.f32.mrf.mxu1 }
 0x1b3   : > { %v241_v12 = vsel %vm240_vm2, %v236_v11, -inf }
 0x1b4   : > { %242 = vmax.xlane.f32.xlu0 %v241_v12 }
 0x1ba   : > { %v238_v13 = vpop.f32.mrf.mxu1 }
 0x227   : > { %v243_v14 = vpop.xlane.xlu0 %242 }
 0x228   : > { %v244_v15 = vsub.f32 %v236_v11, %v243_v14 }
 0x22a   : > { %v245_v16 = vmul.f32 1.442695, %v244_v15 }
 0x22c   : > { %460 = vpow2.f32 %v245_v16 }
 0x232   : > { %v461_v17 = vpop.eup %460 }
 0x233   : > { %v247_v18 = vsel %vm240_vm2, %v461_v17, 0.0 }
 0x234   : > { %248 = vadd.xlane.f32.xlu1 %v247_v18 }
 0x24d   : > { %253 = vrot.lane.b32.xlu1 %v217_v7, %s600_s27 }
 0x2a7   : > { %v249_v19 = vpop.xlane.xlu1 %248 }
 0x2a8   : > { %462 = vrcp.f32 %v249_v19 }
 0x2ae   : > { %v463_v20 = vpop.eup %462 }
 0x2af   : > { %v251_v21 = vmul.f32 %v463_v20, %v461_v17 }
 0x2b1   : > { %v252_v24 = vpack.c.bf16 %v251_v21, %v251_v21 }
 0x2bf   : > { %v254_v22 = vpop.permute.xlu1 %253 }
 0x2c0   : > { %v260_v23 = vsel %vm258_vm3, %v254_v22, 0 }
 0x2c1   : > { %269 = vmatpush.bf16.msra.mxu2 %v260_v23 }
 0x2c4   : > { %392 = vmatmul.msk.bf16.vlgmr.msra.gmra.mxu2 %vm240_vm2, %v252_v24 }
 0x347   : > { %v271_v25 = vpop.f32.mrf.mxu2 }
 0x348   : > { %275 = vst.msk [vmem:[%s177_s15] sm:$0xff] %vm220_vm1, %v271_v25 }
 0x349   : > { %551 = shalt.err (!%p548_p9)
}
 0x34a   : > { %405 = dma.vmem_to_hbm [thread:$0]  (%p676_p13), %s290_s18, 128, %s292_s19, %s277_s20  }
 0x34f   : > { %v273_v26 = vpop.f32.mrf.mxu2 }
 0x350 PF: > { %s303_s29 = sand.u32 1, %s582_s9   ;;  %p770_p10 = scmp.ge.s32.totalorder %s594_s12, 2 }
 0x351   : > { %s304_s5 = scalar_lea.sflag [#allocation4], %s303_s29 }
 0x352   : > { %p416_p11 = pnand %p770_p10, %p681_p4 }
 0x354   : > { %p417_p0 = pneg %p416_p11 }
 0x356   : > { %577 = dma.done.wait (%p417_p0), %s304_s5, 128  }
 0x357   : > { %579 = vsyncadd (%p417_p0), %s304_s5, 4294967168  ;;  %p16_p2 = scmp.ge.s32.totalorder %s656_s23, 4   ;;  %s771_s9 = smov %s586_s10 }
 0x358   : > { %s772_s10 = smov %s590_s11  ;;  %s773_s11 = smov %s668_s26 }
 0x359   : > { %s774_s12 = smov %s656_s23  ;;  %18 = sbr.rel (!%p16_p2) target bundleno = 6 (0x6), region = 77 }
 0x35e   :  { %310 = vsyncpa [#allocation3], 1 }
 0x35f   :  { %312 = vsyncpa [#allocation3 + $0x1], 1 }
 0x360   :  { %313 = vsyncpa [#allocation6], 1 }
 0x361   :  { %314 = vsyncpa [#allocation4], 1 }
 0x362   :  { %316 = vsyncpa [#allocation4 + $0x1], 1 }

</bundles_post_ra>
